<compile_context>
chip_gen: v6e
topology: v6e:2x2x1
jax: 0.10.0
libtpu: 0.0.40
codegen_flags: <defaults>
</compile_context>

<pallas_src>
import functools
import math

import numpy as np

import jax
import jax.numpy as jnp
from jax.experimental import pallas as pl
from jax.experimental.pallas import tpu as pltpu


_VMEM_LIMIT_BYTES = 64 * 1024 * 1024  # fits v7x (64 MiB/TC); plenty on v5e/v6e


def _cparams(*sems):
    return pltpu.CompilerParams(dimension_semantics=sems,
                                vmem_limit_bytes=_VMEM_LIMIT_BYTES)


def _tile(dim, target):
    """Pick a tile size: `target` if it evenly divides `dim`, else the full dim."""
    if dim <= target or dim % target != 0:
        return dim
    return target


# --------------------------------------------------------------------------
# Kernel 1: LayerNorm fused into a projection (used for the QKV projection).
#   x (M, H) f32, gamma/beta (1, H) f32, w (H, N) bf16 -> out (M, N) bf16
# Grid (M/tm, N/tn); the normalized activations are cached in VMEM scratch at
# j == 0 so LN is computed once per row block.
# --------------------------------------------------------------------------
def _ln_matmul_kernel(x_ref, g_ref, b_ref, w_ref, o_ref, h_sc, *, eps):
    @pl.when(pl.program_id(1) == 0)
    def _():
        x = x_ref[...].astype(jnp.float32)
        mean = jnp.mean(x, axis=-1, keepdims=True)
        var = jnp.mean(jnp.square(x - mean), axis=-1, keepdims=True)
        h = (x - mean) * jax.lax.rsqrt(var + eps) * g_ref[...] + b_ref[...]
        h_sc[...] = h.astype(h_sc.dtype)

    o_ref[...] = jnp.dot(h_sc[...], w_ref[...],
                         preferred_element_type=jnp.float32).astype(o_ref.dtype)


def ln_matmul(x, gamma, beta, w, eps, *, tm=256, tn=256):
    M, H = x.shape
    H2, N = w.shape
    assert H == H2
    tm, tn = _tile(M, tm), _tile(N, tn)
    return pl.pallas_call(
        functools.partial(_ln_matmul_kernel, eps=eps),
        out_shape=jax.ShapeDtypeStruct((M, N), jnp.bfloat16),
        grid=(M // tm, N // tn),
        in_specs=[
            pl.BlockSpec((tm, H), lambda i, j: (i, 0)),
            pl.BlockSpec((1, H), lambda i, j: (0, 0)),
            pl.BlockSpec((1, H), lambda i, j: (0, 0)),
            pl.BlockSpec((H, tn), lambda i, j: (0, j)),
        ],
        out_specs=pl.BlockSpec((tm, tn), lambda i, j: (i, j)),
        scratch_shapes=[pltpu.VMEM((tm, H), jnp.bfloat16)],
        compiler_params=_cparams("parallel", "arbitrary"),
    )(x, gamma, beta, w)


# --------------------------------------------------------------------------
# Kernel 2: tiled matmul with K reduction, f32 accumulator and fused residual
# add in the epilogue (used for the o_proj output projection).
#   x (M, K) bf16, w (K, N) bf16, res (M, N) f32 -> out (M, N) f32
# --------------------------------------------------------------------------
def _matmul_res_kernel(x_ref, w_ref, r_ref, o_ref, acc_sc):
    k = pl.program_id(2)

    @pl.when(k == 0)
    def _():
        acc_sc[...] = jnp.zeros_like(acc_sc)

    acc_sc[...] += jnp.dot(x_ref[...], w_ref[...],
                           preferred_element_type=jnp.float32)

    @pl.when(k == pl.num_programs(2) - 1)
    def _():
        o_ref[...] = (acc_sc[...] + r_ref[...].astype(jnp.float32)
                      ).astype(o_ref.dtype)


def matmul_residual(x, w, res, *, tm=256, tn=256, tk=512):
    M, K = x.shape
    K2, N = w.shape
    assert K == K2 and res.shape == (M, N)
    tm, tn, tk = _tile(M, tm), _tile(N, tn), _tile(K, tk)
    return pl.pallas_call(
        _matmul_res_kernel,
        out_shape=jax.ShapeDtypeStruct((M, N), res.dtype),
        grid=(M // tm, N // tn, K // tk),
        in_specs=[
            pl.BlockSpec((tm, tk), lambda i, j, k: (i, k)),
            pl.BlockSpec((tk, tn), lambda i, j, k: (k, j)),
            pl.BlockSpec((tm, tn), lambda i, j, k: (i, j)),
        ],
        out_specs=pl.BlockSpec((tm, tn), lambda i, j, k: (i, j)),
        scratch_shapes=[pltpu.VMEM((tm, tn), jnp.float32)],
        compiler_params=_cparams("parallel", "parallel", "arbitrary"),
    )(x, w, res)


# --------------------------------------------------------------------------
# Kernel 3: fully fused MLP block.
#   out = x + down( silu(LN(x) @ Wg) * (LN(x) @ Wu) )
# Grid (M/tm, I/tk): the intermediate (tm, tk) SwiGLU tile is consumed by the
# down-projection immediately, so the (M, I) intermediate never hits HBM.
# --------------------------------------------------------------------------
def _mlp_kernel(x_ref, g_ref, b_ref, wg_ref, wu_ref, wd_ref, o_ref,
                h_sc, acc_sc, *, eps):
    k = pl.program_id(1)

    @pl.when(k == 0)
    def _():
        x = x_ref[...].astype(jnp.float32)
        mean = jnp.mean(x, axis=-1, keepdims=True)
        var = jnp.mean(jnp.square(x - mean), axis=-1, keepdims=True)
        h = (x - mean) * jax.lax.rsqrt(var + eps) * g_ref[...] + b_ref[...]
        h_sc[...] = h.astype(h_sc.dtype)
        acc_sc[...] = jnp.zeros_like(acc_sc)

    h = h_sc[...]
    g = jnp.dot(h, wg_ref[...], preferred_element_type=jnp.float32)
    u = jnp.dot(h, wu_ref[...], preferred_element_type=jnp.float32)
    s = (g * jax.nn.sigmoid(g) * u).astype(jnp.bfloat16)
    acc_sc[...] += jnp.dot(s, wd_ref[...], preferred_element_type=jnp.float32)

    @pl.when(k == pl.num_programs(1) - 1)
    def _():
        o_ref[...] = (acc_sc[...] + x_ref[...].astype(jnp.float32)
                      ).astype(o_ref.dtype)


def fused_mlp(x, gamma, beta, wg, wu, wd, eps, *, tm=256, tk=512):
    M, H = x.shape
    H2, I = wg.shape
    assert H == H2 and wu.shape == (H, I) and wd.shape == (I, H)
    tm, tk = _tile(M, tm), _tile(I, tk)
    return pl.pallas_call(
        functools.partial(_mlp_kernel, eps=eps),
        out_shape=jax.ShapeDtypeStruct((M, H), x.dtype),
        grid=(M // tm, I // tk),
        in_specs=[
            pl.BlockSpec((tm, H), lambda i, k: (i, 0)),
            pl.BlockSpec((1, H), lambda i, k: (0, 0)),
            pl.BlockSpec((1, H), lambda i, k: (0, 0)),
            pl.BlockSpec((H, tk), lambda i, k: (0, k)),
            pl.BlockSpec((H, tk), lambda i, k: (0, k)),
            pl.BlockSpec((tk, H), lambda i, k: (k, 0)),
        ],
        out_specs=pl.BlockSpec((tm, H), lambda i, k: (i, 0)),
        scratch_shapes=[pltpu.VMEM((tm, H), jnp.bfloat16),
                        pltpu.VMEM((tm, H), jnp.float32)],
        compiler_params=_cparams("parallel", "arbitrary"),
    )(x, gamma, beta, wg, wu, wd)


# --------------------------------------------------------------------------
# Kernel 4: flash-style attention with in-kernel RoPE.
#   q/k/v: (B, nH, S, D) bf16, cos/sin: (S, D) f32, rot: (D, D) bf16
#   grid (B, S/tq, S/tkv); all heads of one batch per block; online softmax
#   state kept in VMEM scratch; rotated Q cached at ikv == 0.
# rotate_half(x) is computed as x @ P with a constant signed-permutation
# matrix P, so RoPE needs no cross-lane shuffles.
# No mask is applied: matches the reference path with attention_mask=None.
# --------------------------------------------------------------------------
def _flash_attn_kernel(q_ref, k_ref, v_ref, cosq_ref, sinq_ref, cosk_ref,
                       sink_ref, rot_ref, o_ref,
                       qrot_sc, m_sc, l_sc, acc_sc, *, scale):
    ikv = pl.program_id(2)

    def rope(x, cos, sin):
        # x: (heads, rows, D) bf16; cos/sin: (rows, D) f32
        h, r, d = x.shape
        xr = jnp.dot(x.reshape(h * r, d), rot_ref[...],
                     preferred_element_type=jnp.float32).reshape(h, r, d)
        return (x.astype(jnp.float32) * cos[None] + xr * sin[None]
                ).astype(jnp.bfloat16)

    @pl.when(ikv == 0)
    def _():
        m_sc[...] = jnp.full_like(m_sc, -jnp.inf)
        l_sc[...] = jnp.zeros_like(l_sc)
        acc_sc[...] = jnp.zeros_like(acc_sc)
        qrot_sc[...] = rope(q_ref[0], cosq_ref[...], sinq_ref[...])

    q = qrot_sc[...]                                       # (nH, tq,  D) bf16
    k = rope(k_ref[0], cosk_ref[...], sink_ref[...])       # (nH, tkv, D) bf16

    s = jnp.einsum("hqd,hkd->hqk", q, k,
                   preferred_element_type=jnp.float32) * scale
    m_new = jnp.maximum(m_sc[...], jnp.max(s, axis=-1, keepdims=True))
    alpha = jnp.exp(m_sc[...] - m_new)
    p = jnp.exp(s - m_new)
    l_sc[...] = alpha * l_sc[...] + jnp.sum(p, axis=-1, keepdims=True)
    acc_sc[...] = alpha * acc_sc[...] + jnp.einsum(
        "hqk,hkd->hqd", p.astype(jnp.bfloat16), v_ref[0],
        preferred_element_type=jnp.float32)
    m_sc[...] = m_new

    @pl.when(ikv == pl.num_programs(2) - 1)
    def _():
        o_ref[0] = (acc_sc[...] * pl.reciprocal(l_sc[...], approx=True)
                    ).astype(o_ref.dtype)


def flash_attention(q, k, v, cos, sin, rot, *, tq=128, tkv=128):
    B, nH, S, D = q.shape
    tq, tkv = _tile(S, tq), _tile(S, tkv)
    scale = 1.0 / math.sqrt(D)
    q_spec = pl.BlockSpec((1, nH, tq, D), lambda b, iq, ikv: (b, 0, iq, 0))
    kv_spec = pl.BlockSpec((1, nH, tkv, D), lambda b, iq, ikv: (b, 0, ikv, 0))
    return pl.pallas_call(
        functools.partial(_flash_attn_kernel, scale=scale),
        out_shape=jax.ShapeDtypeStruct((B, nH, S, D), jnp.bfloat16),
        grid=(B, S // tq, S // tkv),
        in_specs=[
            q_spec, kv_spec, kv_spec,
            pl.BlockSpec((tq, D), lambda b, iq, ikv: (iq, 0)),   # cos @ q rows
            pl.BlockSpec((tq, D), lambda b, iq, ikv: (iq, 0)),   # sin @ q rows
            pl.BlockSpec((tkv, D), lambda b, iq, ikv: (ikv, 0)),  # cos @ kv rows
            pl.BlockSpec((tkv, D), lambda b, iq, ikv: (ikv, 0)),  # sin @ kv rows
            pl.BlockSpec((D, D), lambda b, iq, ikv: (0, 0)),      # rotate_half mat
        ],
        out_specs=q_spec,
        scratch_shapes=[
            pltpu.VMEM((nH, tq, D), jnp.bfloat16),   # rotated Q cache
            pltpu.VMEM((nH, tq, 1), jnp.float32),    # running max
            pltpu.VMEM((nH, tq, 1), jnp.float32),    # running denom
            pltpu.VMEM((nH, tq, D), jnp.float32),    # output accumulator
        ],
        compiler_params=_cparams("parallel", "parallel", "arbitrary"),
    )(q, k, v, cos, sin, cos, sin, rot)


# ------------------------------- JAX glue ----------------------------------

def rope_cos_sin(head_dim, seq_len, base):
    inv_freq = 1.0 / (base ** (jnp.arange(0, head_dim, 2, dtype=jnp.float32)
                               / head_dim))
    t = jnp.arange(seq_len, dtype=jnp.float32)
    freqs = jnp.einsum("i,j->ij", t, inv_freq)            # (S, D/2)
    emb = jnp.concatenate([freqs, freqs], axis=-1)        # (S, D)
    return jnp.cos(emb), jnp.sin(emb)


def _rope_rotation_matrix(D):
    # (x @ P) == rotate_half(x) == cat(-x[..., D/2:], x[..., :D/2])
    half = D // 2
    P = np.zeros((D, D), np.float32)
    P[np.arange(half) + half, np.arange(half)] = -1.0
    P[np.arange(half), np.arange(half) + half] = 1.0
    return jnp.asarray(P)


def llama2_decoder_layer(params, hidden_states, cfg):
    B, S, H = hidden_states.shape
    nH = cfg["num_attention_heads"]
    if cfg["num_key_value_heads"] != nH:
        # TODO(synk): GQA repeat_kv (num_key_value_heads < num_heads) not implemented.
        raise NotImplementedError("only num_key_value_heads == num_attention_heads")
    D = H // nH
    eps = cfg["rms_norm_eps"]
    M = B * S

    x = hidden_states.astype(jnp.float32).reshape(M, H)    # f32 residual stream

    cos, sin = rope_cos_sin(D, S, cfg["rope_theta"])        # (S, D) f32
    rot = _rope_rotation_matrix(D).astype(jnp.bfloat16)     # (D, D)

    p = params
    # ---- self-attention block (LN fused into QKV projection) ----
    qkv = ln_matmul(x, p["ln1_w"], p["ln1_b"], p["wqkv"], eps)   # (M, 3H) bf16
    qkv = qkv.reshape(B, S, 3, nH, D)
    # TODO(synk): the (B,S,nH,D)->(B,nH,S,D) transposes below could be folded
    # into the attention BlockSpecs to avoid the XLA copies.
    q = qkv[:, :, 0].transpose(0, 2, 1, 3)                   # (B, nH, S, D)
    k = qkv[:, :, 1].transpose(0, 2, 1, 3)
    v = qkv[:, :, 2].transpose(0, 2, 1, 3)
    attn = flash_attention(q, k, v, cos, sin, rot)           # (B, nH, S, D) bf16
    attn = attn.transpose(0, 2, 1, 3).reshape(M, H)
    x = matmul_residual(attn, p["wo"], x)                    # o_proj + residual, f32

    # ---- MLP block (LN + gate/up + SwiGLU + down + residual, one kernel) ----
    x = fused_mlp(x, p["ln2_w"], p["ln2_b"], p["wg"], p["wu"], p["wd"], eps)

    # TODO(synk): optional attention_mask / past_key_value / output_attentions
    # paths of LLama2DecoderLayer are not exercised (default-None path only).
    return x.reshape(B, S, H)


def init_params(key, cfg):
    H = cfg["hidden_size"]
    I = cfg["intermediate_size"]
    std = cfg["initializer_range"]
    keys = jax.random.split(key, 7)

    def normal(k, shape):
        return (std * jax.random.normal(k, shape, dtype=jnp.float32)
                ).astype(jnp.bfloat16)

    return dict(
        ln1_w=jnp.ones((1, H), jnp.float32),
        ln1_b=jnp.zeros((1, H), jnp.float32),
        wqkv=jnp.concatenate([normal(keys[0], (H, H)),
                              normal(keys[1], (H, H)),
                              normal(keys[2], (H, H))], axis=1),   # (H, 3H)
        wo=normal(keys[3], (H, H)),
        ln2_w=jnp.ones((1, H), jnp.float32),
        ln2_b=jnp.zeros((1, H), jnp.float32),
        wg=normal(keys[4], (H, I)),
        wu=normal(keys[5], (H, I)),
        wd=normal(keys[6], (I, H)),
    )


if __name__ == "__main__":
    cfg = dict(
        hidden_size=64,
        intermediate_size=128,
        num_attention_heads=4,
        num_key_value_heads=4,
        rms_norm_eps=1e-6,
        rope_theta=10000.0,
        initializer_range=0.02,
    )
    B, S = 2, 8

    key = jax.random.PRNGKey(0)
    pkey, xkey = jax.random.split(key)
    params = init_params(pkey, cfg)
    hidden_states = jax.random.normal(
        xkey, (B, S, cfg["hidden_size"]), dtype=jnp.float32)

    out = llama2_decoder_layer(params, hidden_states, cfg)
    out = jax.block_until_ready(out)
    assert out.shape == (B, S, cfg["hidden_size"])
    assert out.dtype == jnp.float32
    assert bool(jnp.all(jnp.isfinite(out)))
    print("KERNEL_OK")
</pallas_src>

<mosaic_0001>
module attributes {stable_mosaic.version = 11 : i64} {
  func.func @_ln_matmul_kernel(%arg0: i32, %arg1: i32, %arg2: memref<16x64xf32, #tpu.memory_space<vmem>>, %arg3: memref<1x64xf32, #tpu.memory_space<vmem>>, %arg4: memref<1x64xf32, #tpu.memory_space<vmem>>, %arg5: memref<64x192xbf16, #tpu.memory_space<vmem>>, %arg6: memref<16x192xbf16, #tpu.memory_space<vmem>>, %arg7: memref<16x64xbf16, #tpu.memory_space<vmem>>) attributes {dimension_semantics = [#tpu.dimension_semantics<parallel>, #tpu.dimension_semantics<arbitrary>], iteration_bounds = array<i64: 1, 1>, scalar_prefetch = 0 : i64, scratch_operands = 1 : i64, tpu.core_type = #tpu.core_type<tc>, window_params = [{transform_indices = @transform_0, window_bounds = array<i64: 16, 64>}, {pipeline_mode = #tpu.pipeline_mode<synchronous>, transform_indices = @transform_1, window_bounds = array<i64: 1, 64>}, {pipeline_mode = #tpu.pipeline_mode<synchronous>, transform_indices = @transform_2, window_bounds = array<i64: 1, 64>}, {transform_indices = @transform_3, window_bounds = array<i64: 64, 192>}, {transform_indices = @transform_4, window_bounds = array<i64: 16, 192>}]} {
    %c0_i32 = arith.constant 0 : i32
    %0 = arith.cmpi eq, %arg1, %c0_i32 : i32
    %1 = arith.extui %0 : i1 to i32
    %c0_i32_0 = arith.constant 0 : i32
    %2 = arith.cmpi ne, %1, %c0_i32_0 : i32
    scf.if %2 {
      %c0_6 = arith.constant 0 : index
      %c0_7 = arith.constant 0 : index
      %8 = vector.load %arg2[%c0_6, %c0_7] : memref<16x64xf32, #tpu.memory_space<vmem>>, vector<16x64xf32>
      %cst_8 = arith.constant dense<0.000000e+00> : vector<16xf32>
      %9 = vector.multi_reduction <add>, %8, %cst_8 [1] : vector<16x64xf32> to vector<16xf32>
      %10 = vector.shape_cast %9 : vector<16xf32> to vector<16x1xf32>
      %cst_9 = arith.constant 6.400000e+01 : f32
      %11 = vector.broadcast %cst_9 : f32 to vector<16x1xf32>
      %12 = arith.divf %10, %11 : vector<16x1xf32>
      %13 = vector.broadcast %12 : vector<16x1xf32> to vector<16x64xf32>
      %14 = arith.subf %8, %13 : vector<16x64xf32>
      %15 = arith.mulf %14, %14 : vector<16x64xf32>
      %cst_10 = arith.constant dense<0.000000e+00> : vector<16xf32>
      %16 = vector.multi_reduction <add>, %15, %cst_10 [1] : vector<16x64xf32> to vector<16xf32>
      %17 = vector.shape_cast %16 : vector<16xf32> to vector<16x1xf32>
      %cst_11 = arith.constant 6.400000e+01 : f32
      %18 = vector.broadcast %cst_11 : f32 to vector<16x1xf32>
      %19 = arith.divf %17, %18 : vector<16x1xf32>
      %20 = vector.broadcast %12 : vector<16x1xf32> to vector<16x64xf32>
      %21 = arith.subf %8, %20 : vector<16x64xf32>
      %cst_12 = arith.constant 9.99999997E-7 : f32
      %22 = vector.broadcast %cst_12 : f32 to vector<16x1xf32>
      %23 = arith.addf %19, %22 : vector<16x1xf32>
      %24 = math.rsqrt %23 : vector<16x1xf32>
      %25 = vector.broadcast %24 : vector<16x1xf32> to vector<16x64xf32>
      %26 = arith.mulf %21, %25 : vector<16x64xf32>
      %c0_13 = arith.constant 0 : index
      %c0_14 = arith.constant 0 : index
      %27 = vector.load %arg3[%c0_13, %c0_14] : memref<1x64xf32, #tpu.memory_space<vmem>>, vector<1x64xf32>
      %28 = vector.broadcast %27 : vector<1x64xf32> to vector<16x64xf32>
      %29 = arith.mulf %26, %28 : vector<16x64xf32>
      %c0_15 = arith.constant 0 : index
      %c0_16 = arith.constant 0 : index
      %30 = vector.load %arg4[%c0_15, %c0_16] : memref<1x64xf32, #tpu.memory_space<vmem>>, vector<1x64xf32>
      %31 = vector.broadcast %30 : vector<1x64xf32> to vector<16x64xf32>
      %32 = arith.addf %29, %31 : vector<16x64xf32>
      %33 = arith.truncf %32 : vector<16x64xf32> to vector<16x64xbf16>
      %c0_17 = arith.constant 0 : index
      %c0_18 = arith.constant 0 : index
      %34 = vector.load %arg7[%c0_17, %c0_18] : memref<16x64xbf16, #tpu.memory_space<vmem>>, vector<16x64xbf16>
      tpu.vector_store %arg7[%c0_17, %c0_18], %33 {strides = array<i32>} : memref<16x64xbf16, #tpu.memory_space<vmem>>, vector<16x64xbf16>,
    } else {
    }
    %c0 = arith.constant 0 : index
    %c0_1 = arith.constant 0 : index
    %3 = vector.load %arg7[%c0, %c0_1] : memref<16x64xbf16, #tpu.memory_space<vmem>>, vector<16x64xbf16>
    %c0_2 = arith.constant 0 : index
    %c0_3 = arith.constant 0 : index
    %4 = vector.load %arg5[%c0_2, %c0_3] : memref<64x192xbf16, #tpu.memory_space<vmem>>, vector<64x192xbf16>
    %cst = arith.constant dense<0.000000e+00> : vector<16x192xf32>
    %5 = tpu.matmul %3, %4, %cst {dimension_numbers = #tpu.dot_dimension_numbers<[1], [0], [0], [1], [0, 0, 1, 1], [], []>} : vector<16x64xbf16>, vector<64x192xbf16>, vector<16x192xf32> -> vector<16x192xf32>
    %6 = arith.truncf %5 : vector<16x192xf32> to vector<16x192xbf16>
    %c0_4 = arith.constant 0 : index
    %c0_5 = arith.constant 0 : index
    %7 = vector.load %arg6[%c0_4, %c0_5] : memref<16x192xbf16, #tpu.memory_space<vmem>>, vector<16x192xbf16>
    tpu.vector_store %arg6[%c0_4, %c0_5], %6 {strides = array<i32>} : memref<16x192xbf16, #tpu.memory_space<vmem>>, vector<16x192xbf16>,
    return
  }
  func.func @transform_0(%arg0: i32, %arg1: i32) -> (i32, i32) {
    %c0_i32 = arith.constant 0 : i32
    %c0_i32_0 = arith.constant 0 : i32
    return %arg0, %c0_i32 : i32, i32
  }
  func.func @transform_1(%arg0: i32, %arg1: i32) -> (i32, i32) {
    %c0_i32 = arith.constant 0 : i32
    %c0_i32_0 = arith.constant 0 : i32
    %c0_i32_1 = arith.constant 0 : i32
    return %c0_i32, %c0_i32_0 : i32, i32
  }
  func.func @transform_2(%arg0: i32, %arg1: i32) -> (i32, i32) {
    %c0_i32 = arith.constant 0 : i32
    %c0_i32_0 = arith.constant 0 : i32
    %c0_i32_1 = arith.constant 0 : i32
    return %c0_i32, %c0_i32_0 : i32, i32
  }
  func.func @transform_3(%arg0: i32, %arg1: i32) -> (i32, i32) {
    %c0_i32 = arith.constant 0 : i32
    %c0_i32_0 = arith.constant 0 : i32
    return %c0_i32, %arg1 : i32, i32
  }
  func.func @transform_4(%arg0: i32, %arg1: i32) -> (i32, i32) {
    %c0_i32 = arith.constant 0 : i32
    return %arg0, %arg1 : i32, i32
  }
}

</mosaic_0001>

<bundles_post_ra>
// kernel: tpu_custom_call.1
= control target key start
LH: loop header
LB: loop body
LE: loop exit
PB: predicated region body
PF: predicated region fallthrough
CT: control target
= control target key end

     0   :  { %9 = vsyncpa [#allocation4], 0  ;;  %s416_s0 = inlined_call_operand.hbm [shape: f32[16,64], index: 0, kind: input, shape index: {}]   ;;  %s417_s1 = inlined_call_operand.vmem [shape: f32[1,64], index: 1, kind: input, shape index: {}]   ;;  %s418_s2 = inlined_call_operand.vmem [shape: f32[1,64], index: 2, kind: input, shape index: {}]   ;;  %s419_s3 = inlined_call_operand.hbm [shape: bf16[64,192], index: 3, kind: input, shape index: {}]   ;;  %s420_s4 = inlined_call_operand.hbm [shape: bf16[16,192], index: 4, kind: output, shape index: {}]  }
   0x1   :  { %10 = vsyncpa [#allocation7], 0 }
   0x2   :  { %11 = vsyncpa [#allocation5], 0  ;;  %s356_s15 = smov [#allocation3]  }
   0x3   :  { %s17_s16 = sshll.u32 %s356_s15, 4  ;;  %s18_s16 = int_to_ptr.vmem [resolvable:$true] %s17_s16 }
   0x4   :  { %s298_s17 = scalar_lea.vmem %s18_s16, 256  ;;  %p303_p1 = scmp.lt.s32.totalorder %s18_s16, %s18_s16 }
   0x5   :  { %p299_p0 = scmp.ne.s32.totalorder %s18_s16, %s298_s17  ;;  %p304_p2 = scmp.lt.s32.totalorder %s298_s17, %s298_s17 }
   0x7   :  { %p305_p3 = por %p304_p2, %p303_p1 }
   0x9   :  { %p306_p4 = pnand %p305_p3, %p299_p0 }
   0xb   :  { %309 = shalt.err (!%p306_p4)
}
   0xc   :  { %s357_s18 = smov 128   ;;  %s358_s19 = smov 8  }
   0xd   :  { %23 = dma.hbm_to_vmem [thread:$0]  %s416_s0, 256, %s18_s16, [#allocation4], %s357_s18, %s357_s18, %s358_s19  }
   0xe   :  { %s359_s22 = smov [#allocation6]  }
   0xf   :  { %s33_s23 = sshll.u32 %s359_s22, 4  ;;  %s34_s23 = int_to_ptr.vmem [resolvable:$true] %s33_s23 }
  0x10   :  { %s318_s24 = scalar_lea.vmem %s34_s23, 1024  ;;  %p323_p6 = scmp.lt.s32.totalorder %s34_s23, %s34_s23 }
  0x11   :  { %p319_p5 = scmp.ne.s32.totalorder %s34_s23, %s318_s24  ;;  %p324_p7 = scmp.lt.s32.totalorder %s318_s24, %s318_s24 }
  0x13   :  { %p325_p8 = por %p324_p7, %p323_p6 }
  0x15   :  { %p326_p9 = pnand %p325_p8, %p319_p5 }
  0x17   :  { %329 = shalt.err (!%p326_p9)
}
  0x18   :  { %39 = dma.hbm_to_vmem [thread:$0]  %s419_s3, 1024, %s34_s23, [#allocation7], %s357_s18, %s357_s18, %s358_s19  }
  0x19   :  { %350 = dma.done.wait [#allocation4], 256  }
  0x1a   :  { %351 = vsyncadd [#allocation4], 4294967040 }
  0x1b   :  { %352 = dma.done.wait [#allocation7], 1024  }
  0x1c   :  { %353 = vsyncadd [#allocation7], 4294966272  ;;  %vm53_vm0 = vcmask 523264   ;;  %v51_v0 = vld [vmem:[#allocation3] sm:$0xff]  ;;  %v52_v1 = vld [vmem:[#allocation3 + $0x8] sm:$0xff]  ;;  %v360_v22 = vmov 0  }
  0x1d   :  { %v54_v2 = vsel %vm53_vm0, %v51_v0, 0.0  ;;  %v57_v3 = vsel %vm53_vm0, %v52_v1, 0.0  ;;  %v273_v14 = vld [vmem:[#allocation6 + $0x34] ss:$8 sps:$4 sm:$0xff]   ;;  %v275_v15 = vld [vmem:[#allocation6 + $0x30] ss:$8 sps:$4 sm:$0xff]   ;;  %201 = vmatprep.mubr.bf16.mxu0 %v360_v22 }
  0x1e   :  { %55 = vadd.xlane.f32.xlu0 %v54_v2  ;;  %177 = vmatprep.subr.bf16.mxu0 %v273_v14  ;;  %v276_v16 = vld [vmem:[#allocation6 + $0x24] ss:$8 sps:$4 sm:$0xff]   ;;  %v278_v17 = vld [vmem:[#allocation6 + $0x20] ss:$8 sps:$4 sm:$0xff]   ;;  %v279_v18 = vld [vmem:[#allocation6 + $0x14] ss:$8 sps:$4 sm:$0xff]  }
  0x1f   :  { %178 = vmatpush1.bf16.msra.mxu0 %v275_v15  ;;  %v281_v19 = vld [vmem:[#allocation6 + $0x10] ss:$8 sps:$4 sm:$0xff]   ;;  %v282_v20 = vld [vmem:[#allocation6 + $0x4] ss:$8 sps:$4 sm:$0xff]   ;;  %v284_v21 = vld [vmem:[#allocation6] ss:$8 sps:$4 sm:$0xff]  }
  0x20   :  { %179 = vmatprep.subr.bf16.mxu0 %v276_v16  ;;  %v247_v30 = vld [vmem:[%s417_s1] ss:$0 sm:$0xff]  ;;  %vm107_vm1 = vcmask 519168   ;;  %vm224_vm2 = vcmask 1043456   ;;  %vm225_vm3 = vcmask 523268   ;;  %s361_s1 = smov [#allocation8]  }
  0x21   :  { %v248_v32 = vld [vmem:[%s418_s2] ss:$0 sm:$0xff]  ;;  %vm226_vm4 = vmor %vm225_vm3, %vm224_vm2  ;;  %s234_s2 = sshll.u32 %s361_s1, 4  ;;  %s235_s2 = int_to_ptr.vmem [resolvable:$true] %s234_s2 }
  0x22   :  { %58 = vadd.xlane.f32.xlu0 %v57_v3  ;;  %s330_s29 = scalar_lea.vmem %s235_s2, 256  ;;  %p335_p11 = scmp.lt.s32.totalorder %s235_s2, %s235_s2 }
  0x23   :  { %180 = vmatpush1.bf16.msra.mxu0 %v278_v17  ;;  %p331_p10 = scmp.ne.s32.totalorder %s235_s2, %s330_s29  ;;  %p336_p12 = scmp.lt.s32.totalorder %s330_s29, %s330_s29 }
  0x24   :  { %181 = vmatprep.subr.bf16.mxu0 %v279_v18 }
  0x25   :  { %p337_p13 = por %p336_p12, %p335_p11 }
  0x27   :  { %182 = vmatpush1.bf16.msra.mxu0 %v281_v19  ;;  %p338_p0 = pnand %p337_p13, %p331_p10 }
  0x28   :  { %183 = vmatprep.subr.bf16.mxu0 %v282_v20 }
  0x2b   :  { %184 = vmatpush1.bf16.msra.mxu0 %v284_v21 }
  0xa7   :  { %v56_v4 = vpop.xlane.xlu0 %55 }
  0xa8   :  { %v61_v5 = vmul.f32 0.015625, %v56_v4 }
  0xaa   :  { %v63_v6 = vsub.f32 %v51_v0, %v61_v5 }
  0xab   :  { %v59_v7 = vpop.xlane.xlu0 %58 }
  0xac   :  { %v62_v8 = vmul.f32 0.015625, %v59_v7  ;;  %v65_v9 = vmul.f32 %v63_v6, %v63_v6 }
  0xae   :  { %v64_v10 = vsub.f32 %v52_v1, %v62_v8  ;;  %v67_v11 = vsel %vm53_vm0, %v65_v9, 0.0 }
  0xaf   :  { %68 = vadd.xlane.f32.xlu1 %v67_v11 }
  0xb0   :  { %v66_v12 = vmul.f32 %v64_v10, %v64_v10 }
  0xb2   :  { %v70_v13 = vsel %vm53_vm0, %v66_v12, 0.0 }
  0xb3   :  { %71 = vadd.xlane.f32.xlu1 %v70_v13 }
 0x138   :  { %v69_v23 = vpop.xlane.xlu1 %68 }
 0x139   :  { %v73_v24 = vmul.f32 0.015625, %v69_v23 }
 0x13b   :  { %v75_v25 = vadd.f32 1e-06, %v73_v24 }
 0x13c   :  { %v72_v26 = vpop.xlane.xlu1 %71 }
 0x13d   :  { %286 = vrsqrt.f32 %v75_v25  ;;  %v74_v27 = vmul.f32 0.015625, %v72_v26 }
 0x13f   :  { %v76_v28 = vadd.f32 1e-06, %v74_v27 }
 0x141   :  { %288 = vrsqrt.f32 %v76_v28 }
 0x14a   :  { %v287_v29 = vpop.eup %286 }
 0x14b   :  { %v79_v31 = vmul.f32 %v287_v29, %v63_v6 }
 0x14d   :  { %v88_v33 = vmul.f32 %v247_v30, %v79_v31 }
 0x14e   :  { %v289_v34 = vpop.eup %288 }
 0x14f   :  { %v97_v35 = vadd.f32 %v248_v32, %v88_v33  ;;  %v80_v36 = vmul.f32 %v289_v34, %v64_v10 }
 0x151   :  { %v263_v37 = vpack.c.bf16 %v97_v35, %v97_v35  ;;  %v89_v38 = vmul.f32 %v247_v30, %v80_v36 }
 0x153   :  { %108 = vst.msk [vmem:[#allocation2] sm:$0xf] %vm107_vm1, %v263_v37  ;;  %v98_v39 = vadd.f32 %v248_v32, %v89_v38 }
 0x155   :  { %v264_v40 = vpack.c.bf16 %v98_v39, %v98_v39 }
 0x157   :  { %109 = vst.msk [vmem:[#allocation2 + $0x4] sm:$0xf] %vm107_vm1, %v264_v40 }
 0x15e   :  { %v285_v41 = vld [vmem:[#allocation2] sm:$0xff]  }
 0x15f   :  { %260 = vmatmul.mubr.msk.bf16.vlgmr.msra.gmra.mxu0 %vm53_vm0, %v285_v41 }
 0x21f   :  { %v203_v42 = vpop.f32.mrf.mxu0 }
 0x221   :  { %v205_v43 = vpop.f32.mrf.mxu0 }
 0x222   :  { %v265_v44 = vpack.c.bf16 %v205_v43, %v203_v42 }
 0x223   :  { %v207_v45 = vpop.f32.mrf.mxu0 }
 0x224   :  { %227 = vst.msk [vmem:[#allocation8] sm:$0xff] %vm226_vm4, %v265_v44 }
 0x225   :  { %v209_v46 = vpop.f32.mrf.mxu0 }
 0x226   :  { %v266_v47 = vpack.c.bf16 %v209_v46, %v207_v45 }
 0x228   :  { %228 = vst.msk [vmem:[#allocation8 + $0x8] sm:$0xff] %vm226_vm4, %v266_v47 }
 0x229   :  { %341 = shalt.err (!%p338_p0)
}
 0x22a   :  { %240 = dma.vmem_to_hbm [thread:$0]  %s235_s2, 256, %s420_s4, [#allocation5], %s357_s18, %s357_s18, %s358_s19  }
 0x22b   :  { %354 = dma.done.wait [#allocation5], 256  }
 0x22c   :  { %355 = vsyncadd [#allocation5], 4294967040 }
 0x22d   :  { %244 = vsyncpa [#allocation4], 1 }
 0x22e   :  { %245 = vsyncpa [#allocation7], 1 }
 0x22f   :  { %246 = vsyncpa [#allocation5], 1 }

</bundles_post_ra>
